<compile_context>
chip_gen: v7x
topology: tpu7x:2x2x1
jax: 0.10.0
libtpu: 0.0.40
codegen_flags: <defaults>
</compile_context>

<pallas_src>
import functools
import math

import jax
import jax.numpy as jnp
import numpy as np
from jax import lax
from jax.experimental import pallas as pl
from jax.experimental.pallas import tpu as pltpu

_NEG_SLOPE = 0.2
_EPS = 1e-5


# ----------------------------------------------------------------------------
# Fused ResBlk pallas_call factory.
# ----------------------------------------------------------------------------
@functools.lru_cache(maxsize=None)
def _make_resblk_call(B, Cin, Cout, H, W, *, normalize, learned_sc, feature):
    HW = H * W
    inv_sqrt2 = 1.0 / math.sqrt(2.0)
    # Batch blocking: at most 2 grid steps (one per v7x TensorCore); each step
    # processes Bt samples with a short static in-kernel loop.
    n_steps = 2 if (B % 2 == 0 and B >= 2) else 1
    Bt = B // n_steps
    offsets = [(dh, dw) for dh in (-1, 0, 1) for dw in (-1, 0, 1)]
    w_pow2 = (W & (W - 1)) == 0

    def kernel(*refs):
        refs = list(refs)
        out_ref = refs.pop()                       # outputs follow inputs
        x_ref, w1_ref, w2_ref = refs[:3]
        rest = refs[3:]
        wsc_ref = rest.pop(0) if learned_sc else None
        pchan_ref, b2_ref = rest

        # Hoisted lane-position coordinates (shared by all taps / samples).
        col = lax.broadcasted_iota(jnp.int32, (1, HW), 1)        # flat hw index
        ww = (col & (W - 1)) if w_pow2 else (col % W)            # w = hw mod W

        b1 = pchan_ref[:, 0:1]                                   # (Cin, 1)
        if normalize:
            g1, be1 = pchan_ref[:, 1:2], pchan_ref[:, 2:3]
            g2, be2 = pchan_ref[:, 3:4], pchan_ref[:, 4:5]
        b2 = b2_ref[...]                                         # (Cout, 1)
        w1 = w1_ref[...]                                         # (Cin, 9*Cin) bf16
        w2 = w2_ref[...]                                         # (Cout, 9*Cin) bf16

        def leaky(v):
            return jnp.where(v >= 0, v, _NEG_SLOPE * v)

        def inorm(v, gamma, beta):
            # single-pass instance-norm stats over the spatial (lane) axis
            m = jnp.mean(v, axis=1, keepdims=True)
            m2 = jnp.mean(v * v, axis=1, keepdims=True)
            var = jnp.maximum(m2 - m * m, 0.0)       # guard cancellation
            return gamma * (v - m) * lax.rsqrt(var + _EPS) + beta

        def im2col(v):
            # v: (Cin, HW) f32 -> (9*Cin, HW) bf16.  Each tap is a lane roll by
            # dh*W+dw, then the wrapped / out-of-bounds positions are zeroed.
            pieces = []
            for dh, dw in offsets:
                s = dh * W + dw
                rolled = v if s == 0 else pltpu.roll(v, (-s) % HW, axis=1)
                conds = []
                if dh == -1:
                    conds.append(col >= W)                # h-1 >= 0
                elif dh == 1:
                    conds.append(col < (H - 1) * W)       # h+1 <  H
                if dw == -1:
                    conds.append(ww >= 1)                 # w-1 >= 0
                elif dw == 1:
                    conds.append(ww < W - 1)              # w+1 <  W
                if conds:
                    valid = functools.reduce(lambda a, b: a & b, conds)
                    rolled = jnp.where(valid, rolled, 0.0)
                pieces.append(rolled)
            return jnp.concatenate(pieces, axis=0).astype(jnp.bfloat16)

        def conv3x3(v, w_flat, bias):
            # One fused MXU matmul contracting over (tap, cin): K = 9*Cin.
            return jnp.dot(w_flat, im2col(v),
                           preferred_element_type=jnp.float32) + bias

        for i in range(Bt):                          # static per-sample unroll
            x = x_ref[i]                             # (Cin, HW) f32, HW on lanes

            # ---- shortcut branch ----
            if learned_sc:
                sc = jnp.dot(wsc_ref[...], x, preferred_element_type=jnp.float32)
            else:
                sc = x

            # ---- residual branch ----
            t = x
            if normalize:
                t = inorm(t, g1, be1)
            t = leaky(t)
            t = conv3x3(t, w1, b1)                   # conv1: Cin -> Cin
            if normalize:
                t = inorm(t, g2, be2)
            t = leaky(t)
            t = conv3x3(t, w2, b2)                   # conv2: Cin -> Cout

            out = sc + t
            if not feature:
                out = out * inv_sqrt2
            out_ref[i] = out

    n_pchan = 5 if normalize else 1
    in_specs = [
        pl.BlockSpec((Bt, Cin, HW), lambda b: (b, 0, 0)),     # x (per-step batch tile)
        pl.BlockSpec((Cin, 9 * Cin), lambda b: (0, 0)),       # conv1 weights (flat taps)
        pl.BlockSpec((Cout, 9 * Cin), lambda b: (0, 0)),      # conv2 weights (flat taps)
    ]
    if learned_sc:
        in_specs.append(pl.BlockSpec((Cout, Cin), lambda b: (0, 0)))   # 1x1 shortcut
    in_specs += [
        pl.BlockSpec((Cin, n_pchan), lambda b: (0, 0)),       # packed bias+norm params
        pl.BlockSpec((Cout, 1), lambda b: (0, 0)),            # conv2 bias
    ]

    flops = 2 * B * HW * (9 * Cin * Cin + 9 * Cin * Cout
                          + (Cin * Cout if learned_sc else 0))
    bytes_accessed = (4 * B * HW * (Cin + Cout)                # x in, out
                      + 2 * 9 * Cin * (Cin + Cout)             # bf16 weights
                      + 4 * (Cin * n_pchan + Cout)
                      + (4 * Cin * Cout if learned_sc else 0))
    transcendentals = 2 * B * Cin if normalize else 0

    return pl.pallas_call(
        kernel,
        out_shape=jax.ShapeDtypeStruct((B, Cout, HW), jnp.float32),
        grid=(n_steps,),
        in_specs=in_specs,
        out_specs=pl.BlockSpec((Bt, Cout, HW), lambda b: (b, 0, 0)),
        compiler_params=pltpu.CompilerParams(dimension_semantics=("parallel",)),
        cost_estimate=pl.CostEstimate(flops=flops,
                                      transcendentals=transcendentals,
                                      bytes_accessed=bytes_accessed),
    )


# ----------------------------------------------------------------------------
# Python wrapper: pure layout glue (free reshapes, one weight flatten+cast).
# ----------------------------------------------------------------------------
def resblk_forward(x_nchw, params, *, normalize=False, downsample=False,
                   feature=False):
    if downsample:
        # TODO(synk): downsample (F.avg_pool2d(x, 2)) path not implemented.
        raise NotImplementedError("downsample=True not implemented")
    B, Cin, H, W = x_nchw.shape
    Cout = params["conv2_w"].shape[0]
    learned_sc = Cin != Cout
    HW = H * W

    call = _make_resblk_call(B, Cin, Cout, H, W, normalize=normalize,
                             learned_sc=learned_sc, feature=feature)

    def flat_w(w):
        # (co, ci, 3, 3) -> (co, 9*ci); K index = (kh*3+kw)*ci + c, matching the
        # kernel's (tap, channel) im2col row order.  Cast to bf16 for the MXU.
        co, ci = w.shape[0], w.shape[1]
        return jnp.transpose(w, (0, 2, 3, 1)).reshape(co, 9 * ci).astype(jnp.bfloat16)

    args = [
        x_nchw.reshape(B, Cin, HW),        # NCHW is channel-major: free view
        flat_w(params["conv1_w"]),
        flat_w(params["conv2_w"]),
    ]
    if learned_sc:
        args.append(params["conv1x1_w"].reshape(Cout, Cin))
    cols = [params["conv1_b"]]
    if normalize:
        cols += [params["norm1_g"], params["norm1_b"],
                 params["norm2_g"], params["norm2_b"]]
    args.append(jnp.stack(cols, axis=1))                      # (Cin, 1|5)
    args.append(params["conv2_b"].reshape(Cout, 1))

    return call(*args).reshape(B, Cout, H, W)


# ----------------------------------------------------------------------------
# Pure-JAX reference (mirrors the PyTorch module) for the correctness check.
# ----------------------------------------------------------------------------
def _leaky_ref(v):
    return jnp.where(v >= 0, v, 0.2 * v)


def _inorm_ref(v, g, b, eps=1e-5):
    m = jnp.mean(v, axis=(2, 3), keepdims=True)
    var = jnp.mean((v - m) ** 2, axis=(2, 3), keepdims=True)
    vn = (v - m) / jnp.sqrt(var + eps)
    return g[None, :, None, None] * vn + b[None, :, None, None]


def _conv_ref(v, w, b=None):
    y = jax.lax.conv_general_dilated(
        v, w, (1, 1), "SAME", dimension_numbers=("NCHW", "OIHW", "NCHW"))
    if b is not None:
        y = y + b[None, :, None, None]
    return y


def resblk_ref(x, params, *, normalize=False, feature=False):
    Cin, Cout = x.shape[1], params["conv2_w"].shape[0]
    sc = _conv_ref(x, params["conv1x1_w"]) if Cin != Cout else x
    t = x
    if normalize:
        t = _inorm_ref(t, params["norm1_g"], params["norm1_b"])
    t = _leaky_ref(t)
    t = _conv_ref(t, params["conv1_w"], params["conv1_b"])
    if normalize:
        t = _inorm_ref(t, params["norm2_g"], params["norm2_b"])
    t = _leaky_ref(t)
    t = _conv_ref(t, params["conv2_w"], params["conv2_b"])
    out = sc + t
    if not feature:
        out = out / math.sqrt(2.0)
    return out


def _make_params(key, Cin, Cout, normalize):
    ks = jax.random.split(key, 9)
    s = 0.1
    p = {
        "conv1_w": s * jax.random.normal(ks[0], (Cin, Cin, 3, 3), jnp.float32),
        "conv1_b": s * jax.random.normal(ks[1], (Cin,), jnp.float32),
        "conv2_w": s * jax.random.normal(ks[2], (Cout, Cin, 3, 3), jnp.float32),
        "conv2_b": s * jax.random.normal(ks[3], (Cout,), jnp.float32),
    }
    if Cin != Cout:
        p["conv1x1_w"] = s * jax.random.normal(ks[4], (Cout, Cin, 1, 1),
                                               jnp.float32)
    if normalize:
        p["norm1_g"] = 1.0 + s * jax.random.normal(ks[5], (Cin,), jnp.float32)
        p["norm1_b"] = s * jax.random.normal(ks[6], (Cin,), jnp.float32)
        p["norm2_g"] = 1.0 + s * jax.random.normal(ks[7], (Cin,), jnp.float32)
        p["norm2_b"] = s * jax.random.normal(ks[8], (Cin,), jnp.float32)
    return p


# ----------------------------------------------------------------------------
if __name__ == "__main__":
    key = jax.random.PRNGKey(0)
    kx1, kp1, kx2, kp2 = jax.random.split(key, 4)

    # Tolerance reflects bf16 MXU operands (f32 accumulation) in the kernel vs.
    # the full-f32 reference.
    RTOL = ATOL = 2e-2

    # Config A: ResBlk(dim_in=4, dim_out=8) -> learned 1x1 shortcut, no norm.
    x1 = jax.random.normal(kx1, (2, 4, 16, 16), jnp.float32)
    p1 = _make_params(kp1, 4, 8, normalize=False)
    out1 = jax.block_until_ready(resblk_forward(x1, p1))
    ref1 = jax.block_until_ready(resblk_ref(x1, p1))
    np.testing.assert_allclose(np.asarray(out1), np.asarray(ref1),
                               rtol=RTOL, atol=ATOL)

    # Config B: ResBlk(dim_in=8, dim_out=8, normalize=True) -> identity shortcut.
    x2 = jax.random.normal(kx2, (2, 8, 16, 16), jnp.float32)
    p2 = _make_params(kp2, 8, 8, normalize=True)
    out2 = jax.block_until_ready(resblk_forward(x2, p2, normalize=True))
    ref2 = jax.block_until_ready(resblk_ref(x2, p2, normalize=True))
    np.testing.assert_allclose(np.asarray(out2), np.asarray(ref2),
                               rtol=RTOL, atol=ATOL)

    print("KERNEL_OK")
</pallas_src>

<mosaic_0001>
module attributes {stable_mosaic.version = 11 : i64} {
  func.func @kernel(%arg0: i32, %arg1: memref<1x4x256xf32, #tpu.memory_space<vmem>>, %arg2: memref<4x36xbf16, #tpu.memory_space<vmem>>, %arg3: memref<8x36xbf16, #tpu.memory_space<vmem>>, %arg4: memref<8x4xf32, #tpu.memory_space<vmem>>, %arg5: memref<4x1xf32, #tpu.memory_space<vmem>>, %arg6: memref<8x1xf32, #tpu.memory_space<vmem>>, %arg7: memref<1x8x256xf32, #tpu.memory_space<vmem>>) attributes {dimension_semantics = [#tpu.dimension_semantics<parallel>], iteration_bounds = array<i64: 2>, scalar_prefetch = 0 : i64, scratch_operands = 0 : i64, tpu.core_type = #tpu.core_type<tc>, window_params = [{transform_indices = @transform_0, window_bounds = array<i64: 1, 4, 256>}, {pipeline_mode = #tpu.pipeline_mode<synchronous>, transform_indices = @transform_1, window_bounds = array<i64: 4, 36>}, {pipeline_mode = #tpu.pipeline_mode<synchronous>, transform_indices = @transform_2, window_bounds = array<i64: 8, 36>}, {pipeline_mode = #tpu.pipeline_mode<synchronous>, transform_indices = @transform_3, window_bounds = array<i64: 8, 4>}, {pipeline_mode = #tpu.pipeline_mode<synchronous>, transform_indices = @transform_4, window_bounds = array<i64: 4, 1>}, {pipeline_mode = #tpu.pipeline_mode<synchronous>, transform_indices = @transform_5, window_bounds = array<i64: 8, 1>}, {transform_indices = @transform_6, window_bounds = array<i64: 1, 8, 256>}]} {
    %0 = tpu.iota {dimensions = array<i32: 1>} : vector<1x256xi32>
    %c15_i32 = arith.constant 15 : i32
    %1 = vector.broadcast %c15_i32 : i32 to vector<1x256xi32>
    %2 = arith.andi %0, %1 : vector<1x256xi32>
    %c0 = arith.constant 0 : index
    %c0_0 = arith.constant 0 : index
    %3 = vector.load %arg5[%c0, %c0_0] : memref<4x1xf32, #tpu.memory_space<vmem>>, vector<4x1xf32>
    %c0_1 = arith.constant 0 : index
    %c0_2 = arith.constant 0 : index
    %4 = vector.load %arg6[%c0_1, %c0_2] : memref<8x1xf32, #tpu.memory_space<vmem>>, vector<8x1xf32>
    %c0_3 = arith.constant 0 : index
    %c0_4 = arith.constant 0 : index
    %5 = vector.load %arg2[%c0_3, %c0_4] : memref<4x36xbf16, #tpu.memory_space<vmem>>, vector<4x36xbf16>
    %c0_5 = arith.constant 0 : index
    %c0_6 = arith.constant 0 : index
    %6 = vector.load %arg3[%c0_5, %c0_6] : memref<8x36xbf16, #tpu.memory_space<vmem>>, vector<8x36xbf16>
    %c0_7 = arith.constant 0 : index
    %c0_8 = arith.constant 0 : index
    %c0_9 = arith.constant 0 : index
    %7 = vector.load %arg1[%c0_7, %c0_8, %c0_9] : memref<1x4x256xf32, #tpu.memory_space<vmem>>, vector<1x4x256xf32>
    %8 = vector.shape_cast %7 : vector<1x4x256xf32> to vector<4x256xf32>
    %c0_10 = arith.constant 0 : index
    %c0_11 = arith.constant 0 : index
    %9 = vector.load %arg4[%c0_10, %c0_11] : memref<8x4xf32, #tpu.memory_space<vmem>>, vector<8x4xf32>
    %cst = arith.constant dense<0.000000e+00> : vector<8x256xf32>
    %10 = tpu.matmul %9, %8, %cst {dimension_numbers = #tpu.dot_dimension_numbers<[1], [0], [0], [1], [0, 0, 1, 1], [], []>} : vector<8x4xf32>, vector<4x256xf32>, vector<8x256xf32> -> vector<8x256xf32>
    %cst_12 = arith.constant 0.000000e+00 : f32
    %11 = vector.broadcast %cst_12 : f32 to vector<4x256xf32>
    %12 = arith.cmpf oge, %8, %11 : vector<4x256xf32>
    %cst_13 = arith.constant 2.000000e-01 : f32
    %13 = vector.broadcast %cst_13 : f32 to vector<4x256xf32>
    %14 = arith.mulf %13, %8 : vector<4x256xf32>
    %15 = arith.select %12, %8, %14 : vector<4x256xi1>, vector<4x256xf32>
    %c17_i32 = arith.constant 17 : i32
    %16 = tpu.dynamic_rotate %15 by %c17_i32 dim 1 : vector<4x256xf32>, i32 -> vector<4x256xf32>
    %c16_i32 = arith.constant 16 : i32
    %17 = vector.broadcast %c16_i32 : i32 to vector<1x256xi32>
    %18 = arith.cmpi sge, %0, %17 : vector<1x256xi32>
    %c1_i32 = arith.constant 1 : i32
    %19 = vector.broadcast %c1_i32 : i32 to vector<1x256xi32>
    %20 = arith.cmpi sge, %2, %19 : vector<1x256xi32>
    %21 = arith.andi %18, %20 : vector<1x256xi1>
    %cst_14 = arith.constant 0.000000e+00 : f32
    %22 = vector.shape_cast %21 : vector<1x256xi1> to vector<1x256xi1>
    %23 = vector.broadcast %22 : vector<1x256xi1> to vector<4x256xi1>
    %24 = vector.broadcast %cst_14 : f32 to vector<4x256xf32>
    %25 = arith.select %23, %16, %24 : vector<4x256xi1>, vector<4x256xf32>
    %c16_i32_15 = arith.constant 16 : i32
    %26 = tpu.dynamic_rotate %15 by %c16_i32_15 dim 1 : vector<4x256xf32>, i32 -> vector<4x256xf32>
    %c16_i32_16 = arith.constant 16 : i32
    %27 = vector.broadcast %c16_i32_16 : i32 to vector<1x256xi32>
    %28 = arith.cmpi sge, %0, %27 : vector<1x256xi32>
    %cst_17 = arith.constant 0.000000e+00 : f32
    %29 = vector.shape_cast %28 : vector<1x256xi1> to vector<1x256xi1>
    %30 = vector.broadcast %29 : vector<1x256xi1> to vector<4x256xi1>
    %31 = vector.broadcast %cst_17 : f32 to vector<4x256xf32>
    %32 = arith.select %30, %26, %31 : vector<4x256xi1>, vector<4x256xf32>
    %c15_i32_18 = arith.constant 15 : i32
    %33 = tpu.dynamic_rotate %15 by %c15_i32_18 dim 1 : vector<4x256xf32>, i32 -> vector<4x256xf32>
    %c16_i32_19 = arith.constant 16 : i32
    %34 = vector.broadcast %c16_i32_19 : i32 to vector<1x256xi32>
    %35 = arith.cmpi sge, %0, %34 : vector<1x256xi32>
    %c15_i32_20 = arith.constant 15 : i32
    %36 = vector.broadcast %c15_i32_20 : i32 to vector<1x256xi32>
    %37 = arith.cmpi slt, %2, %36 : vector<1x256xi32>
    %38 = arith.andi %35, %37 : vector<1x256xi1>
    %cst_21 = arith.constant 0.000000e+00 : f32
    %39 = vector.shape_cast %38 : vector<1x256xi1> to vector<1x256xi1>
    %40 = vector.broadcast %39 : vector<1x256xi1> to vector<4x256xi1>
    %41 = vector.broadcast %cst_21 : f32 to vector<4x256xf32>
    %42 = arith.select %40, %33, %41 : vector<4x256xi1>, vector<4x256xf32>
    %c1_i32_22 = arith.constant 1 : i32
    %43 = tpu.dynamic_rotate %15 by %c1_i32_22 dim 1 : vector<4x256xf32>, i32 -> vector<4x256xf32>
    %c1_i32_23 = arith.constant 1 : i32
    %44 = vector.broadcast %c1_i32_23 : i32 to vector<1x256xi32>
    %45 = arith.cmpi sge, %2, %44 : vector<1x256xi32>
    %cst_24 = arith.constant 0.000000e+00 : f32
    %46 = vector.shape_cast %45 : vector<1x256xi1> to vector<1x256xi1>
    %47 = vector.broadcast %46 : vector<1x256xi1> to vector<4x256xi1>
    %48 = vector.broadcast %cst_24 : f32 to vector<4x256xf32>
    %49 = arith.select %47, %43, %48 : vector<4x256xi1>, vector<4x256xf32>
    %c255_i32 = arith.constant 255 : i32
    %50 = tpu.dynamic_rotate %15 by %c255_i32 dim 1 : vector<4x256xf32>, i32 -> vector<4x256xf32>
    %c15_i32_25 = arith.constant 15 : i32
    %51 = vector.broadcast %c15_i32_25 : i32 to vector<1x256xi32>
    %52 = arith.cmpi slt, %2, %51 : vector<1x256xi32>
    %cst_26 = arith.constant 0.000000e+00 : f32
    %53 = vector.shape_cast %52 : vector<1x256xi1> to vector<1x256xi1>
    %54 = vector.broadcast %53 : vector<1x256xi1> to vector<4x256xi1>
    %55 = vector.broadcast %cst_26 : f32 to vector<4x256xf32>
    %56 = arith.select %54, %50, %55 : vector<4x256xi1>, vector<4x256xf32>
    %c241_i32 = arith.constant 241 : i32
    %57 = tpu.dynamic_rotate %15 by %c241_i32 dim 1 : vector<4x256xf32>, i32 -> vector<4x256xf32>
    %c240_i32 = arith.constant 240 : i32
    %58 = vector.broadcast %c240_i32 : i32 to vector<1x256xi32>
    %59 = arith.cmpi slt, %0, %58 : vector<1x256xi32>
    %c1_i32_27 = arith.constant 1 : i32
    %60 = vector.broadcast %c1_i32_27 : i32 to vector<1x256xi32>
    %61 = arith.cmpi sge, %2, %60 : vector<1x256xi32>
    %62 = arith.andi %59, %61 : vector<1x256xi1>
    %cst_28 = arith.constant 0.000000e+00 : f32
    %63 = vector.shape_cast %62 : vector<1x256xi1> to vector<1x256xi1>
    %64 = vector.broadcast %63 : vector<1x256xi1> to vector<4x256xi1>
    %65 = vector.broadcast %cst_28 : f32 to vector<4x256xf32>
    %66 = arith.select %64, %57, %65 : vector<4x256xi1>, vector<4x256xf32>
    %c240_i32_29 = arith.constant 240 : i32
    %67 = tpu.dynamic_rotate %15 by %c240_i32_29 dim 1 : vector<4x256xf32>, i32 -> vector<4x256xf32>
    %c240_i32_30 = arith.constant 240 : i32
    %68 = vector.broadcast %c240_i32_30 : i32 to vector<1x256xi32>
    %69 = arith.cmpi slt, %0, %68 : vector<1x256xi32>
    %cst_31 = arith.constant 0.000000e+00 : f32
    %70 = vector.shape_cast %69 : vector<1x256xi1> to vector<1x256xi1>
    %71 = vector.broadcast %70 : vector<1x256xi1> to vector<4x256xi1>
    %72 = vector.broadcast %cst_31 : f32 to vector<4x256xf32>
    %73 = arith.select %71, %67, %72 : vector<4x256xi1>, vector<4x256xf32>
    %c239_i32 = arith.constant 239 : i32
    %74 = tpu.dynamic_rotate %15 by %c239_i32 dim 1 : vector<4x256xf32>, i32 -> vector<4x256xf32>
    %c240_i32_32 = arith.constant 240 : i32
    %75 = vector.broadcast %c240_i32_32 : i32 to vector<1x256xi32>
    %76 = arith.cmpi slt, %0, %75 : vector<1x256xi32>
    %c15_i32_33 = arith.constant 15 : i32
    %77 = vector.broadcast %c15_i32_33 : i32 to vector<1x256xi32>
    %78 = arith.cmpi slt, %2, %77 : vector<1x256xi32>
    %79 = arith.andi %76, %78 : vector<1x256xi1>
    %cst_34 = arith.constant 0.000000e+00 : f32
    %80 = vector.shape_cast %79 : vector<1x256xi1> to vector<1x256xi1>
    %81 = vector.broadcast %80 : vector<1x256xi1> to vector<4x256xi1>
    %82 = vector.broadcast %cst_34 : f32 to vector<4x256xf32>
    %83 = arith.select %81, %74, %82 : vector<4x256xi1>, vector<4x256xf32>
    %84 = tpu.concatenate %25, %32, %42, %49, %15, %56, %66, %73, %83 in 0 : vector<4x256xf32>, vector<4x256xf32>, vector<4x256xf32>, vector<4x256xf32>, vector<4x256xf32>, vector<4x256xf32>, vector<4x256xf32>, vector<4x256xf32>, vector<4x256xf32> -> vector<36x256xf32>
    %85 = arith.truncf %84 : vector<36x256xf32> to vector<36x256xbf16>
    %cst_35 = arith.constant dense<0.000000e+00> : vector<4x256xf32>
    %86 = tpu.matmul %5, %85, %cst_35 {dimension_numbers = #tpu.dot_dimension_numbers<[1], [0], [0], [1], [0, 0, 1, 1], [], []>} : vector<4x36xbf16>, vector<36x256xbf16>, vector<4x256xf32> -> vector<4x256xf32>
    %87 = vector.broadcast %3 : vector<4x1xf32> to vector<4x256xf32>
    %88 = arith.addf %86, %87 : vector<4x256xf32>
    %cst_36 = arith.constant 0.000000e+00 : f32
    %89 = vector.broadcast %cst_36 : f32 to vector<4x256xf32>
    %90 = arith.cmpf oge, %88, %89 : vector<4x256xf32>
    %cst_37 = arith.constant 2.000000e-01 : f32
    %91 = vector.broadcast %cst_37 : f32 to vector<4x256xf32>
    %92 = arith.mulf %91, %88 : vector<4x256xf32>
    %93 = arith.select %90, %88, %92 : vector<4x256xi1>, vector<4x256xf32>
    %c17_i32_38 = arith.constant 17 : i32
    %94 = tpu.dynamic_rotate %93 by %c17_i32_38 dim 1 : vector<4x256xf32>, i32 -> vector<4x256xf32>
    %c16_i32_39 = arith.constant 16 : i32
    %95 = vector.broadcast %c16_i32_39 : i32 to vector<1x256xi32>
    %96 = arith.cmpi sge, %0, %95 : vector<1x256xi32>
    %c1_i32_40 = arith.constant 1 : i32
    %97 = vector.broadcast %c1_i32_40 : i32 to vector<1x256xi32>
    %98 = arith.cmpi sge, %2, %97 : vector<1x256xi32>
    %99 = arith.andi %96, %98 : vector<1x256xi1>
    %cst_41 = arith.constant 0.000000e+00 : f32
    %100 = vector.shape_cast %99 : vector<1x256xi1> to vector<1x256xi1>
    %101 = vector.broadcast %100 : vector<1x256xi1> to vector<4x256xi1>
    %102 = vector.broadcast %cst_41 : f32 to vector<4x256xf32>
    %103 = arith.select %101, %94, %102 : vector<4x256xi1>, vector<4x256xf32>
    %c16_i32_42 = arith.constant 16 : i32
    %104 = tpu.dynamic_rotate %93 by %c16_i32_42 dim 1 : vector<4x256xf32>, i32 -> vector<4x256xf32>
    %c16_i32_43 = arith.constant 16 : i32
    %105 = vector.broadcast %c16_i32_43 : i32 to vector<1x256xi32>
    %106 = arith.cmpi sge, %0, %105 : vector<1x256xi32>
    %cst_44 = arith.constant 0.000000e+00 : f32
    %107 = vector.shape_cast %106 : vector<1x256xi1> to vector<1x256xi1>
    %108 = vector.broadcast %107 : vector<1x256xi1> to vector<4x256xi1>
    %109 = vector.broadcast %cst_44 : f32 to vector<4x256xf32>
    %110 = arith.select %108, %104, %109 : vector<4x256xi1>, vector<4x256xf32>
    %c15_i32_45 = arith.constant 15 : i32
    %111 = tpu.dynamic_rotate %93 by %c15_i32_45 dim 1 : vector<4x256xf32>, i32 -> vector<4x256xf32>
    %c16_i32_46 = arith.constant 16 : i32
    %112 = vector.broadcast %c16_i32_46 : i32 to vector<1x256xi32>
    %113 = arith.cmpi sge, %0, %112 : vector<1x256xi32>
    %c15_i32_47 = arith.constant 15 : i32
    %114 = vector.broadcast %c15_i32_47 : i32 to vector<1x256xi32>
    %115 = arith.cmpi slt, %2, %114 : vector<1x256xi32>
    %116 = arith.andi %113, %115 : vector<1x256xi1>
    %cst_48 = arith.constant 0.000000e+00 : f32
    %117 = vector.shape_cast %116 : vector<1x256xi1> to vector<1x256xi1>
    %118 = vector.broadcast %117 : vector<1x256xi1> to vector<4x256xi1>
    %119 = vector.broadcast %cst_48 : f32 to vector<4x256xf32>
    %120 = arith.select %118, %111, %119 : vector<4x256xi1>, vector<4x256xf32>
    %c1_i32_49 = arith.constant 1 : i32
    %121 = tpu.dynamic_rotate %93 by %c1_i32_49 dim 1 : vector<4x256xf32>, i32 -> vector<4x256xf32>
    %c1_i32_50 = arith.constant 1 : i32
    %122 = vector.broadcast %c1_i32_50 : i32 to vector<1x256xi32>
    %123 = arith.cmpi sge, %2, %122 : vector<1x256xi32>
    %cst_51 = arith.constant 0.000000e+00 : f32
    %124 = vector.shape_cast %123 : vector<1x256xi1> to vector<1x256xi1>
    %125 = vector.broadcast %124 : vector<1x256xi1> to vector<4x256xi1>
    %126 = vector.broadcast %cst_51 : f32 to vector<4x256xf32>
    %127 = arith.select %125, %121, %126 : vector<4x256xi1>, vector<4x256xf32>
    %c255_i32_52 = arith.constant 255 : i32
    %128 = tpu.dynamic_rotate %93 by %c255_i32_52 dim 1 : vector<4x256xf32>, i32 -> vector<4x256xf32>
    %c15_i32_53 = arith.constant 15 : i32
    %129 = vector.broadcast %c15_i32_53 : i32 to vector<1x256xi32>
    %130 = arith.cmpi slt, %2, %129 : vector<1x256xi32>
    %cst_54 = arith.constant 0.000000e+00 : f32
    %131 = vector.shape_cast %130 : vector<1x256xi1> to vector<1x256xi1>
    %132 = vector.broadcast %131 : vector<1x256xi1> to vector<4x256xi1>
    %133 = vector.broadcast %cst_54 : f32 to vector<4x256xf32>
    %134 = arith.select %132, %128, %133 : vector<4x256xi1>, vector<4x256xf32>
    %c241_i32_55 = arith.constant 241 : i32
    %135 = tpu.dynamic_rotate %93 by %c241_i32_55 dim 1 : vector<4x256xf32>, i32 -> vector<4x256xf32>
    %c240_i32_56 = arith.constant 240 : i32
    %136 = vector.broadcast %c240_i32_56 : i32 to vector<1x256xi32>
    %137 = arith.cmpi slt, %0, %136 : vector<1x256xi32>
    %c1_i32_57 = arith.constant 1 : i32
    %138 = vector.broadcast %c1_i32_57 : i32 to vector<1x256xi32>
    %139 = arith.cmpi sge, %2, %138 : vector<1x256xi32>
    %140 = arith.andi %137, %139 : vector<1x256xi1>
    %cst_58 = arith.constant 0.000000e+00 : f32
    %141 = vector.shape_cast %140 : vector<1x256xi1> to vector<1x256xi1>
    %142 = vector.broadcast %141 : vector<1x256xi1> to vector<4x256xi1>
    %143 = vector.broadcast %cst_58 : f32 to vector<4x256xf32>
    %144 = arith.select %142, %135, %143 : vector<4x256xi1>, vector<4x256xf32>
    %c240_i32_59 = arith.constant 240 : i32
    %145 = tpu.dynamic_rotate %93 by %c240_i32_59 dim 1 : vector<4x256xf32>, i32 -> vector<4x256xf32>
    %c240_i32_60 = arith.constant 240 : i32
    %146 = vector.broadcast %c240_i32_60 : i32 to vector<1x256xi32>
    %147 = arith.cmpi slt, %0, %146 : vector<1x256xi32>
    %cst_61 = arith.constant 0.000000e+00 : f32
    %148 = vector.shape_cast %147 : vector<1x256xi1> to vector<1x256xi1>
    %149 = vector.broadcast %148 : vector<1x256xi1> to vector<4x256xi1>
    %150 = vector.broadcast %cst_61 : f32 to vector<4x256xf32>
    %151 = arith.select %149, %145, %150 : vector<4x256xi1>, vector<4x256xf32>
    %c239_i32_62 = arith.constant 239 : i32
    %152 = tpu.dynamic_rotate %93 by %c239_i32_62 dim 1 : vector<4x256xf32>, i32 -> vector<4x256xf32>
    %c240_i32_63 = arith.constant 240 : i32
    %153 = vector.broadcast %c240_i32_63 : i32 to vector<1x256xi32>
    %154 = arith.cmpi slt, %0, %153 : vector<1x256xi32>
    %c15_i32_64 = arith.constant 15 : i32
    %155 = vector.broadcast %c15_i32_64 : i32 to vector<1x256xi32>
    %156 = arith.cmpi slt, %2, %155 : vector<1x256xi32>
    %157 = arith.andi %154, %156 : vector<1x256xi1>
    %cst_65 = arith.constant 0.000000e+00 : f32
    %158 = vector.shape_cast %157 : vector<1x256xi1> to vector<1x256xi1>
    %159 = vector.broadcast %158 : vector<1x256xi1> to vector<4x256xi1>
    %160 = vector.broadcast %cst_65 : f32 to vector<4x256xf32>
    %161 = arith.select %159, %152, %160 : vector<4x256xi1>, vector<4x256xf32>
    %162 = tpu.concatenate %103, %110, %120, %127, %93, %134, %144, %151, %161 in 0 : vector<4x256xf32>, vector<4x256xf32>, vector<4x256xf32>, vector<4x256xf32>, vector<4x256xf32>, vector<4x256xf32>, vector<4x256xf32>, vector<4x256xf32>, vector<4x256xf32> -> vector<36x256xf32>
    %163 = arith.truncf %162 : vector<36x256xf32> to vector<36x256xbf16>
    %cst_66 = arith.constant dense<0.000000e+00> : vector<8x256xf32>
    %164 = tpu.matmul %6, %163, %cst_66 {dimension_numbers = #tpu.dot_dimension_numbers<[1], [0], [0], [1], [0, 0, 1, 1], [], []>} : vector<8x36xbf16>, vector<36x256xbf16>, vector<8x256xf32> -> vector<8x256xf32>
    %165 = vector.broadcast %4 : vector<8x1xf32> to vector<8x256xf32>
    %166 = arith.addf %164, %165 : vector<8x256xf32>
    %167 = arith.addf %10, %166 : vector<8x256xf32>
    %cst_67 = arith.constant 0.707106769 : f32
    %168 = vector.broadcast %cst_67 : f32 to vector<8x256xf32>
    %169 = arith.mulf %167, %168 : vector<8x256xf32>
    %c0_68 = arith.constant 0 : index
    %c0_69 = arith.constant 0 : index
    %c0_70 = arith.constant 0 : index
    %170 = vector.load %arg7[%c0_68, %c0_69, %c0_70] : memref<1x8x256xf32, #tpu.memory_space<vmem>>, vector<1x8x256xf32>
    %171 = vector.shape_cast %170 : vector<1x8x256xf32> to vector<8x256xf32>
    %172 = vector.shape_cast %169 : vector<8x256xf32> to vector<1x8x256xf32>
    tpu.vector_store %arg7[%c0_68, %c0_69, %c0_70], %172 {strides = array<i32>} : memref<1x8x256xf32, #tpu.memory_space<vmem>>, vector<1x8x256xf32>,
    return
  }
  func.func @transform_0(%arg0: i32) -> (i32, i32, i32) {
    %c0_i32 = arith.constant 0 : i32
    %c0_i32_0 = arith.constant 0 : i32
    %c0_i32_1 = arith.constant 0 : i32
    return %arg0, %c0_i32, %c0_i32_0 : i32, i32, i32
  }
  func.func @transform_1(%arg0: i32) -> (i32, i32) {
    %c0_i32 = arith.constant 0 : i32
    %c0_i32_0 = arith.constant 0 : i32
    %c0_i32_1 = arith.constant 0 : i32
    return %c0_i32, %c0_i32_0 : i32, i32
  }
  func.func @transform_2(%arg0: i32) -> (i32, i32) {
    %c0_i32 = arith.constant 0 : i32
    %c0_i32_0 = arith.constant 0 : i32
    %c0_i32_1 = arith.constant 0 : i32
    return %c0_i32, %c0_i32_0 : i32, i32
  }
  func.func @transform_3(%arg0: i32) -> (i32, i32) {
    %c0_i32 = arith.constant 0 : i32
    %c0_i32_0 = arith.constant 0 : i32
    %c0_i32_1 = arith.constant 0 : i32
    return %c0_i32, %c0_i32_0 : i32, i32
  }
  func.func @transform_4(%arg0: i32) -> (i32, i32) {
    %c0_i32 = arith.constant 0 : i32
    %c0_i32_0 = arith.constant 0 : i32
    %c0_i32_1 = arith.constant 0 : i32
    return %c0_i32, %c0_i32_0 : i32, i32
  }
  func.func @transform_5(%arg0: i32) -> (i32, i32) {
    %c0_i32 = arith.constant 0 : i32
    %c0_i32_0 = arith.constant 0 : i32
    %c0_i32_1 = arith.constant 0 : i32
    return %c0_i32, %c0_i32_0 : i32, i32
  }
  func.func @transform_6(%arg0: i32) -> (i32, i32, i32) {
    %c0_i32 = arith.constant 0 : i32
    %c0_i32_0 = arith.constant 0 : i32
    %c0_i32_1 = arith.constant 0 : i32
    return %arg0, %c0_i32, %c0_i32_0 : i32, i32, i32
  }
}

</mosaic_0001>

<bundles_post_ra>
// kernel: tpu_custom_call.1
= control target key start
LH: loop header
LB: loop body
LE: loop exit
PB: predicated region body
PF: predicated region fallthrough
CT: control target
= control target key end

     0   :  { %11 = vsyncpa [#allocation3], 0  ;;  %s1434_s0 = inlined_call_operand.vmem [shape: f32[2,4,256], index: 0, kind: input, shape index: {}]   ;;  %s1435_s1 = inlined_call_operand.vmem [shape: bf16[4,36], index: 1, kind: input, shape index: {}]   ;;  %s1436_s2 = inlined_call_operand.vmem [shape: bf16[8,36], index: 2, kind: input, shape index: {}]   ;;  %s1437_s3 = inlined_call_operand.vmem [shape: f32[8,4], index: 3, kind: input, shape index: {}]   ;;  %s1438_s4 = inlined_call_operand.vmem [shape: f32[4,1], index: 4, kind: input, shape index: {}]   ;;  %s1439_s5 = inlined_call_operand.vmem [shape: f32[8,1], index: 5, kind: input, shape index: {}]   ;;  %s1440_s6 = inlined_call_operand.hbm [shape: f32[2,8,256], index: 6, kind: output, shape index: {}]  }
   0x1   :  { %13 = vsyncpa [#allocation3 + $0x1], 0  ;;  %s1068_s21 = smov 0   ;;  %s1070_s22 = smov 0  }
   0x2   :  { %s1072_s23 = smov 0   ;;  %s1074_s24 = smov 0  }
   0x3 LB: > { %s1089_s25 = sadd.s32 4294967295, %s1020_s24   ;;  %s806_s26 = sadd.s32 4294967294, %s1020_s24   ;;  %s1020_s24 = sphi %s1074_s24, %s1481_s24   ;;  %s1016_s23 = sphi %s1072_s23, %s1480_s23   ;;  %s1012_s22 = sphi %s1070_s22, %s1479_s22   ;;  %s1008_s21 = sphi %s1068_s21, %s1478_s21  }
   0x4   : > { %s1093_s27 = sadd.s32 1, %s1020_s24   ;;  %s157_s28 = sadd.s32 1, %s1016_s23 }
   0x5   : > { %s154_s29 = ssub.s32 %s1020_s24, %s1093_s27  ;;  %p167_p0 = scmp.ne.s32.totalorder %s1016_s23, %s1012_s22 }
   0x6   : > { %p155_p1 = scmp.eq.s32.totalorder %s154_s29, 0  ;;  %p168_p2 = scmp.eq.s32.totalorder %s1089_s25, 1 }
   0x7   : > { %p173_p3 = scmp.ne.s32.totalorder %s1012_s22, %s1008_s21  ;;  %p174_p4 = scmp.eq.s32.totalorder %s806_s26, 1 }
   0x8   : > { %s1104_s30 = scalar_select %p155_p1, %s1016_s23, %s157_s28  }
   0x9   : > { %p1106_p5 = por %p168_p2, %p167_p0  ;;  %p1110_p6 = por %p174_p4, %p173_p3 }
   0xa   : > { %p809_p7 = scmp.ge.s32.totalorder %s1020_s24, 1  ;;  %p215_p8 = scmp.lt.s32.totalorder %s1020_s24, 3 }
   0xc   : > { %p216_p9 = pnand %p809_p7, %p215_p8 }
   0xd   : > { %p245_p10 = scmp.lt.s32.totalorder (!%p216_p9), %s1089_s25, 1  ;;  %s1022_s14 = smov (!%p216_p9), 17   ;;  %v1030_v5 = vmov (!%p216_p9), 0   ;;  %v256_v6 = vld [vmem:[%s1438_s4] sm:$0xf] (!%p216_p9)  ;;  %v251_v7 = vlaneseq (!%p216_p9)  ;;  %vm412_vm11 = vcmask (!%p216_p9), 1043456  }
   0xe   : > { %219 = sbr.rel (%p216_p9) target bundleno = 773 (0x305), region = 44  ;;  %s1023_s15 = smov (!%p216_p9), 1   ;;  %475 = vmatprep.mubr.bf16.mxu0 (!%p216_p9), %v1030_v5  ;;  %916 = vset.pattern.permute.xlu0 (!%p216_p9), %v1030_v5 }
   0xf   : > { %s1024_s16 = smov (!%p216_p9), 15   ;;  %s1025_s17 = smov (!%p216_p9), 16   ;;  %638 = vmatprep.mubr.bf16.mxu1 (!%p216_p9), %v1030_v5  ;;  %v1145_v8 = vand.u32 (!%p216_p9), 127, %v251_v7 }
  0x10   : > { %s1026_s18 = smov (!%p216_p9), 127   ;;  %s1027_s19 = smov (!%p216_p9), 112  }
  0x11   : > { %s1028_s20 = smov (!%p216_p9), 113   ;;  %s1029_s26 = smov (!%p216_p9), 111   ;;  %v1148_v9 = vadd.s32 (!%p216_p9), 128, %v1145_v8  ;;  %v254_v10 = vand.u32 (!%p216_p9), 15, %v1145_v8  ;;  %vm321_vm1 = vcmp.lt.s32.totalorder (!%p216_p9), %v1145_v8, 1  ;;  %vm291_vm2 = vcmp.lt.s32.totalorder (!%p216_p9), %v1145_v8, 16 }
  0x12   : > { %vm1441_vm3 = vcmp.lt.s32.totalorder (!%p216_p9), %v1145_v8, 17  ;;  %vm1447_vm6 = vcmp.ge.s32.totalorder (!%p216_p9), %v1145_v8, 16  ;;  %vm334_vm9 = vcmp.lt.s32.totalorder (!%p216_p9), %v1145_v8, 127  ;;  %vm1443_vm10 = vcmp.lt.s32.totalorder (!%p216_p9), %v1145_v8, 15 }
  0x13   : > { %v255_v11 = vand.u32 (!%p216_p9), 15, %v1148_v9  ;;  %vm1155_vm4 = vcmp.lt.s32.totalorder (!%p216_p9), %v254_v10, 15  ;;  %vm1164_vm7 = vcmp.ge.s32.totalorder (!%p216_p9), %v254_v10, 1  ;;  %vm1444_vm13 = vcmp.lt.s32.totalorder (!%p216_p9), %v1148_v9, 240 }
  0x14   : > { %vm1186_vm12 = vmand (!%p216_p9), %vm1447_vm6, %vm1164_vm7  ;;  %vm1442_vm14 = vcmp.lt.s32.totalorder (!%p216_p9), %v1145_v8, 112  ;;  %vm1446_vm15 = vcmp.lt.s32.totalorder (!%p216_p9), %v1145_v8, 113 }
  0x15   : > { %s246_s9 = scalar_select %p245_p10, %s1089_s25, 1  ;;  %vm1159_vm5 = vcmp.ge.s32.totalorder %v255_v11, 1  ;;  %vm1168_vm8 = vcmp.lt.s32.totalorder %v255_v11, 15 }
  0x17   : > { %s825_s10 = sshll.u32 %s246_s9, 3 }
  0x18   : > { %s249_s13 = scalar_lea.vmem %s1434_s0, %s825_s10 }
  0x19   : > { %v1121_v0 = vld [vmem:[%s249_s13] sm:$0xff] }
  0x1a   : > { %vm262_vm0 = vcmp.ge.f32.partialorder %v1121_v0, 0.0  ;;  %v263_v1 = vmul.f32 0.2, %v1121_v0 }
  0x1c   : > { %v1126_v2 = vsel %vm262_vm0, %v1121_v0, %v263_v1  ;;  %vm1201_vm0 = vmand %vm1447_vm6, %vm1155_vm4 }
  0x1d   : > { %v1130_v3 = vcombine.high %v1126_v2, %v1126_v2 }
  0x1f   : > { %v886_v4 = vpack.i.bf16 %v1130_v3, %v1126_v2 }
  0x21   : > { %887 = vrot.lane.b32.xlu1 %v886_v4, %s1022_s14  ;;  %877 = vrot.lane.b32.xlu0 %v886_v4, %s1023_s15 }
  0x25   : > { %892 = vrot.lane.b32.xlu1 %v886_v4, %s1024_s16  ;;  %882 = vrot.lane.b32.xlu0 %v886_v4, %s1025_s17 }
  0x29   : > { %897 = vrot.lane.b32.xlu0 %v886_v4, %s1026_s18  ;;  %902 = vrot.lane.b32.xlu1 %v886_v4, %s1027_s19 }
  0x2d   : > { %907 = vrot.lane.b32.xlu0 %v886_v4, %s1028_s20  ;;  %912 = vrot.lane.b32.xlu1 %v886_v4, %s1029_s26 }
  0x31   : > { %429 = vperm.xlu0 %916, %v256_v6  }
  0x93   : > { %v888_v12 = vpop.permute.xlu1 %887  ;;  %v878_v13 = vpop.permute.xlu0 %877 }
  0x94   : > { %v890_v17 = vunpack.i.h.bf16 %v888_v12  ;;  %v889_v18 = vunpack.i.l.bf16 %v888_v12  ;;  %v880_v19 = vunpack.i.h.bf16 %v878_v13  ;;  %v879_v20 = vunpack.i.l.bf16 %v878_v13 }
  0x96   : > { %v322_v22 = vsel %vm321_vm1, %v879_v20, %v880_v19  ;;  %v323_v23 = vsel %vm321_vm1, %v880_v19, %v879_v20  ;;  %v273_v24 = vsel %vm1441_vm3, %v889_v18, %v890_v17  ;;  %v274_v25 = vsel %vm1441_vm3, %v890_v17, %v889_v18 }
  0x97   : > { %v893_v27 = vpop.permute.xlu1 %892  ;;  %v883_v28 = vpop.permute.xlu0 %882  ;;  %v329_v29 = vsel %vm1159_vm5, %v322_v22, 0.0  ;;  %v328_v30 = vsel %vm1164_vm7, %v323_v23, 0.0  ;;  %v286_v36 = vsel %vm1159_vm5, %v273_v24, 0.0  ;;  %v285_v38 = vsel %vm1186_vm12, %v274_v25, 0.0  ;;  %v259_v23 = vld [vmem:[%s1436_s2] sm:$0xf] }
  0x98   : > { %v895_v31 = vunpack.i.h.bf16 %v893_v27  ;;  %v894_v32 = vunpack.i.l.bf16 %v893_v27  ;;  %v885_v33 = vunpack.i.h.bf16 %v883_v28  ;;  %v884_v34 = vunpack.i.l.bf16 %v883_v28 }
  0x99   : > { %v397_v37 = vrot.slane %v329_v29, 4  ;;  %v396_v39 = vrot.slane %v328_v30, 4  ;;  %vm1445_vm3 = vcmp.lt.s32.totalorder %v1145_v8, 111 }
  0x9a   : > { %v293_v40 = vsel %vm291_vm2, %v885_v33, %v884_v34  ;;  %v292_v41 = vsel %vm291_vm2, %v884_v34, %v885_v33  ;;  %v305_v42 = vsel %vm1443_vm10, %v894_v32, %v895_v31  ;;  %v306_v43 = vsel %vm1443_vm10, %v895_v31, %v894_v32  ;;  %vm1254_vm10 = vmand %vm1444_vm13, %vm1168_vm8 }
  0x9b   : > { %v898_v44 = vpop.permute.xlu0 %897  ;;  %v903_v45 = vpop.permute.xlu1 %902  ;;  %v316_v46 = vsel %vm1168_vm8, %v305_v42, 0.0  ;;  %v391_v47 = vrot.slane %v292_v41, 4  ;;  %v298_v48 = vsel %vm1447_vm6, %v293_v40, 0.0  ;;  %v315_v49 = vsel %vm1201_vm0, %v306_v43, 0.0  ;;  %v258_v42 = vld [vmem:[%s1435_s1] sm:$0x3] }
  0x9c   : > { %v900_v50 = vunpack.i.h.bf16 %v898_v44  ;;  %v899_v51 = vunpack.i.l.bf16 %v898_v44  ;;  %v905_v52 = vunpack.i.h.bf16 %v903_v45  ;;  %v904_v53 = vunpack.i.l.bf16 %v903_v45 }
  0x9d   : > { %v414_v54 = vsel %vm412_vm11, %v286_v36, %v391_v47  ;;  %v416_v55 = vsel %vm412_vm11, %v316_v46, %v397_v37  ;;  %v390_v56 = vrot.slane %v298_v48, 4  ;;  %v415_v57 = vsel %vm412_vm11, %v315_v49, %v396_v39 }
  0x9e   : > { %v335_v58 = vsel %vm334_vm9, %v899_v51, %v900_v50  ;;  %v336_v59 = vsel %vm334_vm9, %v900_v50, %v899_v51  ;;  %v365_v60 = vsel %vm1442_vm14, %v904_v53, %v905_v52  ;;  %v366_v61 = vsel %vm1442_vm14, %v905_v52, %v904_v53  ;;  %vm1246_vm14 = vmand %vm1444_vm13, %vm1159_vm5 }
  0x9f   : > { %v341_v62 = vsel %vm1155_vm4, %v335_v58, 0.0  ;;  %v342_v63 = vsel %vm1168_vm8, %v336_v59, 0.0  ;;  %v372_v1 = vsel %vm1444_vm13, %v366_v61, 0.0  ;;  %v408_v4 = vrot.slane %v365_v60, 4  ;;  %v908_v5 = vpop.permute.xlu0 %907  ;;  %v913_v6 = vpop.permute.xlu1 %912 }
  0xa0   : > { %v402_v7 = vrot.slane %v341_v62, 4  ;;  %v403_v10 = vrot.slane %v342_v63, 4  ;;  %v409_v11 = vrot.slane %v372_v1, 4  ;;  %v910_v12 = vunpack.i.h.bf16 %v908_v5 }
  0xa1   : > { %v909_v13 = vunpack.i.l.bf16 %v908_v5  ;;  %v422_v17 = vpack.c.bf16 %v416_v55, %v414_v54  ;;  %v413_v18 = vsel %vm412_vm11, %v285_v38, %v390_v56  ;;  %v915_v19 = vunpack.i.h.bf16 %v913_v6  ;;  %v257_v55 = vld [vmem:[%s1439_s5] sm:$0xff] }
  0xa2   : > { %v421_v22 = vpack.c.bf16 %v415_v57, %v413_v18  ;;  %v914_v24 = vunpack.i.l.bf16 %v913_v6  ;;  %v418_v28 = vsel %vm412_vm11, %v1130_v3, %v403_v10  ;;  %v417_v29 = vsel %vm412_vm11, %v1126_v2, %v402_v7  ;;  %v261_v57 = vld [vmem:[%s1437_s3] sm:$0xff] }
  0xa3   : > { %v348_v25 = vsel %vm1446_vm15, %v909_v13, %v910_v12  ;;  %v349_v27 = vsel %vm1446_vm15, %v910_v12, %v909_v13  ;;  %443 = vmatprep.subr.bf16.mxu0 %v422_v17  ;;  %vm436_vm13 = vcmask 1041408   ;;  %v648_v56 = vcombine.high %v1121_v0, %v1121_v0 }
  0xa4   : > { %444 = vmatpush1.bf16.msra.mxu0 %v421_v22  ;;  %v379_v30 = vsel %vm1445_vm3, %v915_v19, %v914_v24  ;;  %v359_v31 = vsel %vm1246_vm14, %v349_v27, 0.0  ;;  %v358_v32 = vsel %vm1164_vm7, %v348_v25, 0.0  ;;  %v378_v33 = vsel %vm1445_vm3, %v914_v24, %v915_v19 }
  0xa5   : > { %v387_v34 = vsel %vm1254_vm10, %v379_v30, 0.0  ;;  %v420_v3 = vsel %vm412_vm11, %v359_v31, %v409_v11  ;;  %v419_v2 = vsel %vm412_vm11, %v358_v32, %v408_v4  ;;  %v386_v36 = vsel %vm1155_vm4, %v378_v33, 0.0 }
  0xa6   : > { %v424_v37 = vpack.c.bf16 %v420_v3, %v418_v28  ;;  %v423_v38 = vpack.c.bf16 %v419_v2, %v417_v29  ;;  %v426_v39 = vpack.c.bf16 %v387_v34, %v387_v34  ;;  %v425_v40 = vpack.c.bf16 %v386_v36, %v386_v36 }
  0xa7   : > { %vm432_vm3 = vcmask 293888   ;;  %v1031_v58 = vmov 0.0  }
  0xa8   : > { %445 = vmatprep.subr.bf16.mxu0 %v424_v37  ;;  %v438_v41 = vsel %vm436_vm13, %v425_v40, 0 }
  0xa9   : > { %446 = vmatpush1.bf16.msra.mxu0 %v423_v38 }
  0xaa   : > { %813 = vmatprep.subr.msk.bf16.mxu0 %vm436_vm13, %v426_v39 }
  0xad   : > { %448 = vmatpush1.bf16.msra.mxu0 %v438_v41 }
  0xae   : > { %817 = vmatprep.subr.msk.mxu0 %vm412_vm11, %v648_v56 }
  0xb0   : > { %814 = vmatmul.mubr.msk.bf16.vlgmr.msra.gmra.mrb[0].mxu0 %vm432_vm3, %v258_v42  ;;  %v430_v43 = vpop.permute.xlu0 %429 }
  0xb1   : > { %818 = vmatpush1.msk.msra.mxu0 %vm412_vm11, %v1121_v0  ;;  %721 = vmatprep.mubr.f32.mxu0 %v1031_v58 }
 0x183   : > { %v477_v44 = vpop.f32.mrb[0].mxu0 }
 0x184   : > { %v478_v45 = vadd.f32 %v477_v44, %v430_v43  ;;  %v479_v46 = vpop.f32.mrb[1].mxu0 }
 0x185   : > { %v480_v47 = vadd.f32 %v479_v46, %v430_v43  ;;  %v481_v48 = vpop.f32.mrb[2].mxu0 }
 0x186   : > { %vm484_vm15 = vcmp.ge.f32.partialorder %v478_v45, 0.0  ;;  %v486_v49 = vmul.f32 0.2, %v478_v45  ;;  %v482_v50 = vpop.f32.mrb[3].mxu0 }
 0x187   : > { %vm485_vm6 = vcmp.ge.f32.partialorder %v480_v47, 0.0  ;;  %v487_v51 = vmul.f32 0.2, %v480_v47 }
 0x188   : > { %v1286_v52 = vsel %vm484_vm15, %v478_v45, %v486_v49  ;;  %vm1466_vm15 = vcmp.lt.s32.totalorder %v1145_v8, 17 }
 0x189   : > { %v1288_v53 = vsel %vm485_vm6, %v480_v47, %v487_v51  ;;  %vm649_vm6 = vcmask 31744  }
 0x18a   : > { %v927_v54 = vpack.i.bf16 %v1288_v53, %v1286_v52  ;;  %819 = vmatmul.mubr.msk.f32.vlgmr.msra.gmra.mrb[4].mxu0 %vm649_vm6, %v261_v57  ;;  %vm1467_vm6 = vmmov %vm1466_vm15 }
 0x18c   : > { %928 = vrot.lane.b32.xlu0 %v927_v54, %s1022_s14  ;;  %918 = vrot.lane.b32.xlu1 %v927_v54, %s1023_s15 }
 0x190   : > { %938 = vrot.lane.b32.xlu0 %v927_v54, %s1026_s18  ;;  %923 = vrot.lane.b32.xlu1 %v927_v54, %s1025_s17  ;;  %s242_s17 = sand.u32 1, %s1012_s22  }
 0x191   : > { %s810_s18 = sshll.u32 %s242_s17, 4  ;;  %s733_s10 = scalar_lea.sflag [#allocation3], %s242_s17 }
 0x194   : > { %948 = vrot.lane.b32.xlu0 %v927_v54, %s1028_s20  ;;  %933 = vrot.lane.b32.xlu1 %v927_v54, %s1024_s16  ;;  %s244_s20 = scalar_lea.vmem [#allocation2], %s810_s18 }
 0x198   : > { %594 = vperm.xlu0 %916, %v257_v55   ;;  %943 = vrot.lane.b32.xlu1 %v927_v54, %s1027_s19  ;;  %s826_s19 = sshll.u32 %s1089_s25, 8  ;;  %s1032_s25 = smov [#allocation2]  }
 0x199   : > { %s1392_s9 = scalar_lea.hbm %s1440_s6, %s826_s19  ;;  %s962_s12 = sshll.u32 %s1032_s25, 4  ;;  %s963_s12 = int_to_ptr.vmem [resolvable:$false] %s962_s12 }
 0x19a   : > { %s964_s13 = scalar_lea.vmem %s963_s12, 512 }
 0x19c   : > { %953 = vrot.lane.b32.xlu1 %v927_v54, %s1029_s26  ;;  %s747_s26 = sshll.u32 %s244_s20, 4  ;;  %s1394_s26 = int_to_ptr.vmem [resolvable:$true] %s747_s26 }
 0x19d   : > { %s958_s11 = scalar_lea.vmem %s1394_s26, 256  ;;  %p965_p0 = scmp.lt.s32.totalorder %s1394_s26, %s963_s12 }
 0x19e   : > { %p959_p11 = scmp.ne.s32.totalorder %s1394_s26, %s958_s11  ;;  %p966_p1 = scmp.lt.s32.totalorder %s964_s13, %s958_s11 }
 0x1a0   : > { %p960_p12 = pnand %p959_p11, %p1106_p5  ;;  %p967_p2 = por %p966_p1, %p965_p0 }
 0x1a2   : > { %p961_p13 = pneg %p960_p12 }
 0x1a4   : > { %p968_p3 = pnand %p967_p2, %p961_p13 }
 0x1fe   : > { %v929_v59 = vpop.permute.xlu0 %928  ;;  %v919_v60 = vpop.permute.xlu1 %918 }
 0x1ff   : > { %v921_v61 = vunpack.i.h.bf16 %v919_v60  ;;  %v920_v62 = vunpack.i.l.bf16 %v919_v60  ;;  %v931_v63 = vunpack.i.h.bf16 %v929_v59  ;;  %v930_v1 = vunpack.i.l.bf16 %v929_v59 }
 0x201   : > { %v518_v4 = vsel %vm321_vm1, %v920_v62, %v921_v61  ;;  %v519_v0 = vsel %vm321_vm1, %v921_v61, %v920_v62  ;;  %v494_v13 = vsel %vm1466_vm15, %v930_v1, %v931_v63  ;;  %v495_v18 = vsel %vm1467_vm6, %v931_v63, %v930_v1 }
 0x202   : > { %v939_v5 = vpop.permute.xlu0 %938  ;;  %v924_v6 = vpop.permute.xlu1 %923  ;;  %v521_v17 = vsel %vm1159_vm5, %v518_v4, 0.0  ;;  %v520_v25 = vsel %vm1164_vm7, %v519_v0, 0.0  ;;  %vm1468_vm1 = vcmp.ge.s32.totalorder %v1145_v8, 16  ;;  %v497_v3 = vsel %vm1159_vm5, %v494_v13, 0.0 }
 0x203   : > { %v941_v7 = vunpack.i.h.bf16 %v939_v5  ;;  %v940_v10 = vunpack.i.l.bf16 %v939_v5  ;;  %v926_v11 = vunpack.i.h.bf16 %v924_v6  ;;  %v925_v12 = vunpack.i.l.bf16 %v924_v6 }
 0x204   : > { %v496_v37 = vsel %vm1186_vm12, %v495_v18, 0.0  ;;  %v563_v41 = vrot.slane %v521_v17, 4  ;;  %v562_v42 = vrot.slane %v520_v25, 4  ;;  %vm1473_vm15 = vcmp.lt.s32.totalorder %v1145_v8, 112 }
 0x205   : > { %v527_v19 = vsel %vm334_vm9, %v941_v7, %v940_v10  ;;  %v503_v22 = vsel %vm291_vm2, %v926_v11, %v925_v12  ;;  %v502_v24 = vsel %vm291_vm2, %v925_v12, %v926_v11  ;;  %v526_v27 = vsel %vm334_vm9, %v940_v10, %v941_v7  ;;  %vm1474_vm6 = vmmov %vm1473_vm15 }
 0x206   : > { %v529_v28 = vsel %vm1168_vm8, %v527_v19, 0.0  ;;  %v949_v29 = vpop.permute.xlu0 %948  ;;  %v934_v30 = vpop.permute.xlu1 %933  ;;  %v557_v31 = vrot.slane %v502_v24, 4  ;;  %v504_v32 = vsel %vm1468_vm1, %v503_v22, 0.0  ;;  %v528_v39 = vsel %vm1155_vm4, %v526_v27, 0.0 }
 0x207   : > { %v951_v33 = vunpack.i.h.bf16 %v949_v29  ;;  %v950_v34 = vunpack.i.l.bf16 %v949_v29  ;;  %v936_v2 = vunpack.i.h.bf16 %v934_v30  ;;  %v935_v36 = vunpack.i.l.bf16 %v934_v30 }
 0x208   : > { %v556_v38 = vrot.slane %v504_v32, 4  ;;  %v569_v40 = vrot.slane %v529_v28, 4  ;;  %vm1469_vm2 = vcmp.lt.s32.totalorder %v1145_v8, 113  ;;  %vm1470_vm9 = vcmp.lt.s32.totalorder %v1145_v8, 15 }
 0x209   : > { %v534_v43 = vsel %vm1469_vm2, %v950_v34, %v951_v33  ;;  %v510_v15 = vsel %vm1470_vm9, %v935_v36, %v936_v2  ;;  %v579_v45 = vsel %vm412_vm11, %v497_v3, %v557_v31  ;;  %vm1471_vm5 = vmmov %vm1470_vm9  ;;  %v568_v59 = vrot.slane %v528_v39, 4 }
 0x20a   : > { %v944_v44 = vpop.permute.xlu1 %943  ;;  %v511_v26 = vsel %vm1471_vm5, %v936_v2, %v935_v36  ;;  %v513_v48 = vsel %vm1168_vm8, %v510_v15, 0.0  ;;  %vm1472_vm12 = vmmov %vm1469_vm2  ;;  %v578_v54 = vsel %vm412_vm11, %v496_v37, %v556_v38  ;;  %vm1475_vm8 = vcmp.lt.s32.totalorder %v1148_v9, 240 }
 0x20b   : > { %v946_v46 = vunpack.i.h.bf16 %v944_v44  ;;  %v945_v47 = vunpack.i.l.bf16 %v944_v44  ;;  %v512_v49 = vsel %vm1201_vm0, %v511_v26, 0.0  ;;  %v535_v50 = vsel %vm1472_vm12, %v951_v33, %v950_v34 }
 0x20c   : > { %v581_v51 = vsel %vm412_vm11, %v513_v48, %v563_v41  ;;  %v580_v55 = vsel %vm412_vm11, %v512_v49, %v562_v42  ;;  %v536_v4 = vsel %vm1164_vm7, %v534_v43, 0.0  ;;  %v537_v0 = vsel %vm1246_vm14, %v535_v50, 0.0 }
 0x20d   : > { %v542_v56 = vsel %vm1473_vm15, %v945_v47, %v946_v46  ;;  %v543_v57 = vsel %vm1474_vm6, %v946_v46, %v945_v47  ;;  %v587_v21 = vpack.c.bf16 %v581_v51, %v579_v45  ;;  %v586_v58 = vpack.c.bf16 %v580_v55, %v578_v54 }
 0x20e   : > { %v545_v35 = vsel %vm1475_vm8, %v543_v57, 0.0  ;;  %v574_v60 = vrot.slane %v542_v56, 4  ;;  %v954_v61 = vpop.permute.xlu1 %953  ;;  %vm1476_vm0 = vcmp.lt.s32.totalorder %v1145_v8, 111  ;;  %v583_v9 = vsel %vm412_vm11, %v1288_v53, %v569_v40 }
 0x20f   : > { %v575_v62 = vrot.slane %v545_v35, 4  ;;  %v956_v63 = vunpack.i.h.bf16 %v954_v61  ;;  %v955_v1 = vunpack.i.l.bf16 %v954_v61  ;;  %606 = vmatprep.subr.bf16.mxu1 %v587_v21  ;;  %vm1477_vm1 = vmmov %vm1476_vm0  ;;  %v582_v20 = vsel %vm412_vm11, %v1286_v52, %v568_v59 }
 0x210   : > { %607 = vmatpush1.bf16.msra.mxu1 %v586_v58  ;;  %v584_v5 = vsel %vm412_vm11, %v536_v4, %v574_v60 }
 0x211   : > { %v551_v6 = vsel %vm1476_vm0, %v956_v63, %v955_v1  ;;  %v585_v7 = vsel %vm412_vm11, %v537_v0, %v575_v62  ;;  %v550_v10 = vsel %vm1477_vm1, %v955_v1, %v956_v63  ;;  %v588_v17 = vpack.c.bf16 %v584_v5, %v582_v20 }
 0x212   : > { %v553_v16 = vsel %vm1254_vm10, %v551_v6, 0.0  ;;  %v589_v11 = vpack.c.bf16 %v585_v7, %v583_v9  ;;  %v552_v12 = vsel %vm1155_vm4, %v550_v10, 0.0 }
 0x213   : > { %v591_v13 = vpack.c.bf16 %v553_v16, %v553_v16  ;;  %v590_v53 = vpack.c.bf16 %v552_v12, %v552_v12 }
 0x214   : > { %608 = vmatprep.subr.bf16.mxu1 %v589_v11 }
 0x215   : > { %609 = vmatpush1.bf16.msra.mxu1 %v588_v17  ;;  %v601_v8 = vsel %vm436_vm13, %v590_v53, 0 }
 0x216   : > { %815 = vmatprep.subr.msk.bf16.mxu1 %vm436_vm13, %v591_v13 }
 0x217   : > { %v595_v18 = vpop.permute.xlu0 %594 }
 0x219   : > { %611 = vmatpush1.bf16.msra.mxu1 %v601_v8 }
 0x21c   : > { %816 = vmatmul.mubr.msk.bf16.vlgmr.msra.gmra.mrb[0].mxu1 %vm432_vm3, %v259_v23 }
 0x25d   : > { %v723_v52 = vpop.f32.mrb[4].mxu0 }
 0x25e   : > { %v725_v14 = vpop.f32.mrb[5].mxu0 }
 0x2ef   : > { %v640_v19 = vpop.f32.mrb[0].mxu1 }
 0x2f0   : > { %v641_v22 = vadd.f32 %v640_v19, %v595_v18  ;;  %v642_v24 = vpop.f32.mrb[1].mxu1 }
 0x2f1   : > { %v643_v25 = vadd.f32 %v642_v24, %v595_v18  ;;  %v644_v27 = vpop.f32.mrb[2].mxu1 }
 0x2f2   : > { %v724_v28 = vadd.f32 %v723_v52, %v641_v22  ;;  %v645_v29 = vpop.f32.mrb[3].mxu1 }
 0x2f3   : > { %v726_v30 = vadd.f32 %v725_v14, %v643_v25 }
 0x2f4   : > { %v728_v31 = vmul.f32 0.70710677, %v724_v28 }
 0x2f5   : > { %v729_v32 = vmul.f32 0.70710677, %v726_v30 }
 0x2f6   : > { %730 = vst [vmem:[%s244_s20] sm:$0xff] %v728_v31 }
 0x2f7   : > { %731 = vst [vmem:[%s244_s20 + $0x8] sm:$0xff] %v729_v32 }
 0x2f8   : > { %971 = shalt.err (!%p968_p3)
}
 0x2f9   : > { %s972_s14 = scalar_lea.hbm %s1392_s9, 256  ;;  %s976_s17 = scalar_lea.hbm %s1440_s6, 512 }
 0x2fa   : > { %p973_p4 = scmp.ne.s32.totalorder %s1392_s9, %s972_s14  ;;  %p977_p9 = scmp.lt.u32.totalorder %s1392_s9, %s1440_s6 }
 0x2fb   : > { %p978_p10 = scmp.lt.u32.totalorder %s976_s17, %s972_s14  ;;  %p980_p12 = scmp.lt.u32.totalorder %s972_s14, %s1392_s9 }
 0x2fc   : > { %p974_p7 = pnand %p973_p4, %p1106_p5 }
 0x2fd   : > { %p979_p11 = por %p978_p10, %p977_p9 }
 0x2fe   : > { %p975_p8 = pneg %p974_p7 }
 0x2ff   : > { %p981_p13 = por %p980_p12, %p979_p11 }
 0x301   : > { %p982_p0 = pnand %p981_p13, %p975_p8 }
 0x303   : > { %985 = shalt.err (!%p982_p0)
}
 0x304   : > { %827 = dma.vmem_to_hbm [thread:$0]  (%p1106_p5), %s1394_s26, 256, %s1392_s9, %s733_s10  }
 0x305 PF: > { %p833_p1 = scmp.ge.s32.totalorder %s1020_s24, 2  ;;  %s759_s20 = sand.u32 1, %s1008_s21  }
 0x306   : > { %s760_s28 = scalar_lea.sflag [#allocation3], %s759_s20 }
 0x307   : > { %p830_p2 = pnand %p833_p1, %p1110_p6 }
 0x309   : > { %1003 = dma.done.wait (!%p830_p2), %s760_s28, 256  }
 0x30a   : > { %1005 = vsyncadd (!%p830_p2), %s760_s28, 4294967040  ;;  %p16_p3 = scmp.ge.s32.totalorder %s1093_s27, 4   ;;  %s1478_s21 = smov %s1012_s22 }
 0x30b   : > { %s1479_s22 = smov %s1016_s23  ;;  %s1480_s23 = smov %s1104_s30 }
 0x30c   : > { %s1481_s24 = smov %s1093_s27  ;;  %18 = sbr.rel (!%p16_p3) target bundleno = 3 (0x3), region = 79 }
 0x313   :  { %765 = vsyncpa [#allocation3], 1 }
 0x314   :  { %767 = vsyncpa [#allocation3 + $0x1], 1 }

</bundles_post_ra>
